<compile_context>
chip_gen: v7x
topology: tpu7x:2x2x1
jax: 0.10.0
libtpu: 0.0.40
codegen_flags: <defaults>
</compile_context>

<pallas_src>
import math

import jax
import jax.numpy as jnp
from jax.experimental import pallas as pl
from jax.experimental.pallas import tpu as pltpu


_TILE_BYTES = 4 * 1024 * 1024      # per-input, per-buffer streaming tile target
_ACC_SUBLANES = 8                  # folded accumulator height (one sublane group)


def _round_up(x: int, m: int) -> int:
    return ((x + m - 1) // m) * m


def _cdiv(a: int, b: int) -> int:
    return -(-a // b)


def _num_tensorcores() -> int:
    """2 on v7x (2 TensorCores/chip), 1 on v5e/v6e and as the safe default."""
    try:
        kind = jax.devices()[0].device_kind.lower()
    except Exception:
        return 1
    return 2 if ("v7" in kind or "7x" in kind) else 1


def _make_elbo_kernel(*, rows, block_rows, lane, acc_rows, blocks_per_split,
                      covered_blocks, n_elems):
    fold = block_rows // acc_rows
    full_blocks = rows // block_rows                   # blocks with every row valid
    needs_mask = covered_blocks * block_rows != rows   # any partial/redundant block
    half_log_2pi_total = 0.5 * math.log(2.0 * math.pi) * float(n_elems)

    def elbo_kernel(x_ref, xr_ref, mu_ref, lv_ref, o_ref, acc_ref):
        s = pl.program_id(0)                  # split index ("parallel", one per TC)
        j = pl.program_id(1)                  # row-block within split ("arbitrary")
        last_j = pl.num_programs(1) - 1

        @pl.when(j == 0)
        def _init():
            acc_ref[...] = jnp.zeros_like(acc_ref)

        # Hot path: pure VPU.  Fold (block_rows, lane) -> (acc_rows, lane) with a
        # sublane-group-aligned reshape (lowers to vreg adds, not XLU).
        d = x_ref[...].astype(jnp.float32) - xr_ref[...].astype(jnp.float32)
        dd = d * d

        def folded(v):
            return jnp.sum(v.reshape(fold, acc_rows, lane), axis=0)

        g = s * blocks_per_split + j          # global row-block index (unclamped)

        if not needs_mask:
            acc_ref[...] += folded(dd)
        else:
            if full_blocks > 0:
                @pl.when(g < full_blocks)
                def _full_block():
                    acc_ref[...] += folded(dd)

            @pl.when(g >= full_blocks)
            def _boundary_block():
                # Rows past `rows` hold unspecified (possibly NaN) data: use a
                # select, never a 0/1-mask multiply.
                row_ids = jax.lax.broadcasted_iota(jnp.int32, (block_rows, lane), 0)
                valid = (row_ids + g * block_rows) < rows
                acc_ref[...] += folded(jnp.where(valid, dd, 0.0))

        @pl.when(j == last_j)
        def _emit_partial():
            o_ref[...] = (jnp.zeros(o_ref.shape, jnp.float32)
                          + 0.5 * jnp.sum(acc_ref[...]))

        @pl.when((j == last_j) & (s == 0))
        def _add_kl_and_const():
            mu = mu_ref[...].astype(jnp.float32)
            lv = lv_ref[...].astype(jnp.float32)
            kl = 0.5 * jnp.sum(jnp.exp(lv) + mu * mu - 1.0 - lv)
            o_ref[...] = o_ref[...] + (kl + half_log_2pi_total)

    return elbo_kernel


def elbo_forward(x, x_rec, z_mu, z_logvar):
    """Scalar ELBO = gaussian NLL(x | x_rec, var=1, full) + KL(q || N(0, I))."""
    n_elems = int(x.size)

    xf = x.reshape(-1)
    xrf = x_rec.reshape(-1)

    # Lane-dense (rows, lane) layout without any HBM copy when 128-aligned.
    lane = None
    for cand in (512, 256, 128):
        if n_elems % cand == 0:
            lane = cand
            break
    if lane is None:
        # TODO(synk): sizes not a multiple of 128 still pay one pad copy; a manual
        # pl.ANY + DMA tail path could remove it but isn't worth the complexity.
        lane = 128
        pad = (-n_elems) % lane
        xf = jnp.pad(xf, (0, pad))
        xrf = jnp.pad(xrf, (0, pad))

    total = int(xf.shape[0])
    rows = total // lane
    x2 = xf.reshape(rows, lane)
    xr2 = xrf.reshape(rows, lane)

    zm2 = z_mu.reshape(1, -1)
    zlv2 = z_logvar.reshape(1, -1)

    # Split the streaming across TensorCores (v7x has 2); never split tiny inputs.
    splits = max(1, min(_num_tensorcores(), rows // (2 * _ACC_SUBLANES)))

    # Byte-sized streaming tiles (~4 MiB per input per buffer), dtype-adaptive;
    # clamp to the problem size for small inputs.
    max_item = max(jnp.dtype(x.dtype).itemsize, jnp.dtype(x_rec.dtype).itemsize)
    cap = max((_TILE_BYTES // (lane * max_item)) // _ACC_SUBLANES * _ACC_SUBLANES,
              _ACC_SUBLANES)
    rows_per_split = _cdiv(rows, splits)
    if splits == 1 and rows_per_split <= cap:
        block_rows = rows                    # single full-extent block, no masking
    else:
        block_rows = min(cap, _round_up(rows_per_split, _ACC_SUBLANES))
    blocks_per_split = _cdiv(rows_per_split, block_rows)
    num_blocks = _cdiv(rows, block_rows)     # blocks containing any valid row
    covered_blocks = splits * blocks_per_split

    acc_rows = _ACC_SUBLANES if block_rows % _ACC_SUBLANES == 0 else block_rows

    if covered_blocks > num_blocks:
        # Redundant trailing blocks (odd block count split 2 ways) re-read the last
        # valid block; the in-kernel row mask zeroes their contribution.
        def data_map(s, j):
            return (jnp.minimum(s * blocks_per_split + j, num_blocks - 1), 0)
    else:
        def data_map(s, j):
            return (s * blocks_per_split + j, 0)

    kernel = _make_elbo_kernel(
        rows=rows, block_rows=block_rows, lane=lane, acc_rows=acc_rows,
        blocks_per_split=blocks_per_split, covered_blocks=covered_blocks,
        n_elems=n_elems)

    cost = pl.CostEstimate(
        flops=4 * total + 6 * int(z_mu.size),
        transcendentals=int(z_logvar.size),
        bytes_accessed=(
            total * (jnp.dtype(x.dtype).itemsize + jnp.dtype(x_rec.dtype).itemsize)
            + 4 * (int(z_mu.size) + int(z_logvar.size))
            + 4 * splits * 8 * 128),
    )

    out = pl.pallas_call(
        kernel,
        out_shape=jax.ShapeDtypeStruct((splits * 8, 128), jnp.float32),
        grid_spec=pltpu.PrefetchScalarGridSpec(
            num_scalar_prefetch=0,
            grid=(splits, blocks_per_split),
            in_specs=[
                pl.BlockSpec((block_rows, lane), data_map),
                pl.BlockSpec((block_rows, lane), data_map),
                pl.BlockSpec(zm2.shape, lambda s, j: (0, 0)),
                pl.BlockSpec(zlv2.shape, lambda s, j: (0, 0)),
            ],
            out_specs=pl.BlockSpec((8, 128), lambda s, j: (s, 0)),
            scratch_shapes=[pltpu.VMEM((acc_rows, lane), jnp.float32)],
        ),
        compiler_params=pltpu.CompilerParams(
            # On v7x the leading "parallel" axis shards across the two TensorCores;
            # pltpu.CORE_PARALLEL is the fallback knob if xprof shows one TC idle.
            dimension_semantics=("parallel", "arbitrary"),
            vmem_limit_bytes=48 * 1024 * 1024,
        ),
        cost_estimate=cost,
    )(x2, xr2, zm2, zlv2)

    # One scalar per split, replicated over its (8, 128) output tile.
    return jnp.sum(out.reshape(splits, 8, 128)[:, 0, 0])


def elbo_reference(x, x_rec, z_mu, z_logvar):
    x = x.astype(jnp.float32)
    x_rec = x_rec.astype(jnp.float32)
    rec = jnp.sum(0.5 * (x - x_rec) ** 2 + 0.5 * jnp.log(2.0 * jnp.pi))
    kl = 0.5 * jnp.sum(jnp.exp(z_logvar) + z_mu**2 - 1.0 - z_logvar)
    return rec + kl


if __name__ == "__main__":
    key = jax.random.PRNGKey(0)
    k1, k2, k3, k4 = jax.random.split(key, 4)

    B, C, H, W = 2, 4, 16, 16
    LATENT = 32

    x = jax.random.normal(k1, (B, C, H, W), dtype=jnp.float32)
    x_rec = jax.random.normal(k2, (B, C, H, W), dtype=jnp.float32)
    z_mu = jax.random.normal(k3, (B, LATENT), dtype=jnp.float32)
    z_logvar = 0.1 * jax.random.normal(k4, (B, LATENT), dtype=jnp.float32)

    out = jax.block_until_ready(elbo_forward(x, x_rec, z_mu, z_logvar))

    ref = elbo_reference(x, x_rec, z_mu, z_logvar)
    assert jnp.allclose(out, ref, rtol=1e-5, atol=1e-3), (out, ref)

    print("KERNEL_OK")
</pallas_src>

<mosaic_0001>
module attributes {stable_mosaic.version = 11 : i64} {
  func.func @elbo_kernel(%arg0: i32, %arg1: i32, %arg2: memref<4x512xf32, #tpu.memory_space<vmem>>, %arg3: memref<4x512xf32, #tpu.memory_space<vmem>>, %arg4: memref<1x64xf32, #tpu.memory_space<vmem>>, %arg5: memref<1x64xf32, #tpu.memory_space<vmem>>, %arg6: memref<8x128xf32, #tpu.memory_space<vmem>>, %arg7: memref<4x512xf32, #tpu.memory_space<vmem>>) attributes {dimension_semantics = [#tpu.dimension_semantics<parallel>, #tpu.dimension_semantics<arbitrary>], iteration_bounds = array<i64: 1, 1>, scalar_prefetch = 0 : i64, scratch_operands = 1 : i64, tpu.core_type = #tpu.core_type<tc>, window_params = [{transform_indices = @transform_0, window_bounds = array<i64: 4, 512>}, {transform_indices = @transform_1, window_bounds = array<i64: 4, 512>}, {pipeline_mode = #tpu.pipeline_mode<synchronous>, transform_indices = @transform_2, window_bounds = array<i64: 1, 64>}, {pipeline_mode = #tpu.pipeline_mode<synchronous>, transform_indices = @transform_3, window_bounds = array<i64: 1, 64>}, {transform_indices = @transform_4, window_bounds = array<i64: 8, 128>}]} {
    %c0_i32 = arith.constant 0 : i32
    %0 = arith.cmpi eq, %arg1, %c0_i32 : i32
    %1 = arith.extui %0 : i1 to i32
    %c0_i32_0 = arith.constant 0 : i32
    %2 = arith.cmpi ne, %1, %c0_i32_0 : i32
    scf.if %2 {
      %cst_13 = arith.constant 0.000000e+00 : f32
      %20 = vector.broadcast %cst_13 : f32 to vector<4x512xf32>
      %c0_14 = arith.constant 0 : index
      %c0_15 = arith.constant 0 : index
      %21 = vector.load %arg7[%c0_14, %c0_15] : memref<4x512xf32, #tpu.memory_space<vmem>>, vector<4x512xf32>
      tpu.vector_store %arg7[%c0_14, %c0_15], %20 {strides = array<i32>} : memref<4x512xf32, #tpu.memory_space<vmem>>, vector<4x512xf32>,
    } else {
    }
    %c0 = arith.constant 0 : index
    %c0_1 = arith.constant 0 : index
    %3 = vector.load %arg2[%c0, %c0_1] : memref<4x512xf32, #tpu.memory_space<vmem>>, vector<4x512xf32>
    %c0_2 = arith.constant 0 : index
    %c0_3 = arith.constant 0 : index
    %4 = vector.load %arg3[%c0_2, %c0_3] : memref<4x512xf32, #tpu.memory_space<vmem>>, vector<4x512xf32>
    %5 = arith.subf %3, %4 : vector<4x512xf32>
    %6 = arith.mulf %5, %5 : vector<4x512xf32>
    %c0_4 = arith.constant 0 : index
    %c0_5 = arith.constant 0 : index
    %7 = vector.load %arg7[%c0_4, %c0_5] : memref<4x512xf32, #tpu.memory_space<vmem>>, vector<4x512xf32>
    %8 = vector.shape_cast %6 : vector<4x512xf32> to vector<1x4x512xf32>
    %cst = arith.constant dense<0.000000e+00> : vector<4x512xf32>
    %9 = vector.multi_reduction <add>, %8, %cst [0] : vector<1x4x512xf32> to vector<4x512xf32>
    %10 = arith.addf %7, %9 : vector<4x512xf32>
    %c0_6 = arith.constant 0 : index
    %c0_7 = arith.constant 0 : index
    %11 = vector.load %arg7[%c0_6, %c0_7] : memref<4x512xf32, #tpu.memory_space<vmem>>, vector<4x512xf32>
    tpu.vector_store %arg7[%c0_6, %c0_7], %10 {strides = array<i32>} : memref<4x512xf32, #tpu.memory_space<vmem>>, vector<4x512xf32>,
    %c0_i32_8 = arith.constant 0 : i32
    %12 = arith.cmpi eq, %arg1, %c0_i32_8 : i32
    %13 = arith.extui %12 : i1 to i32
    %c0_i32_9 = arith.constant 0 : i32
    %14 = arith.cmpi ne, %13, %c0_i32_9 : i32
    scf.if %14 {
      %cst_13 = arith.constant 0.000000e+00 : f32
      %20 = vector.broadcast %cst_13 : f32 to vector<8x128xf32>
      %c0_14 = arith.constant 0 : index
      %c0_15 = arith.constant 0 : index
      %21 = vector.load %arg7[%c0_14, %c0_15] : memref<4x512xf32, #tpu.memory_space<vmem>>, vector<4x512xf32>
      %22 = vector.shape_cast %21 : vector<4x512xf32> to vector<1x4x512xf32>
      %cst_16 = arith.constant dense<0.000000e+00> : vector<1xf32>
      %23 = vector.multi_reduction <add>, %22, %cst_16 [1, 2] : vector<1x4x512xf32> to vector<1xf32>
      %24 = vector.shape_cast %23 : vector<1xf32> to vector<1x1x1xf32>
      %25 = vector.extract %24[0, 0, 0] : f32 from vector<1x1x1xf32>
      %cst_17 = arith.constant 5.000000e-01 : f32
      %26 = arith.mulf %cst_17, %25 : f32
      %27 = vector.broadcast %26 : f32 to vector<8x128xf32>
      %28 = arith.addf %20, %27 : vector<8x128xf32>
      %c0_18 = arith.constant 0 : index
      %c0_19 = arith.constant 0 : index
      %29 = vector.load %arg6[%c0_18, %c0_19] : memref<8x128xf32, #tpu.memory_space<vmem>>, vector<8x128xf32>
      tpu.vector_store %arg6[%c0_18, %c0_19], %28 {strides = array<i32>} : memref<8x128xf32, #tpu.memory_space<vmem>>, vector<8x128xf32>,
    } else {
    }
    %c0_i32_10 = arith.constant 0 : i32
    %15 = arith.cmpi eq, %arg1, %c0_i32_10 : i32
    %c0_i32_11 = arith.constant 0 : i32
    %16 = arith.cmpi eq, %arg0, %c0_i32_11 : i32
    %17 = arith.andi %15, %16 : i1
    %18 = arith.extui %17 : i1 to i32
    %c0_i32_12 = arith.constant 0 : i32
    %19 = arith.cmpi ne, %18, %c0_i32_12 : i32
    scf.if %19 {
      %c0_13 = arith.constant 0 : index
      %c0_14 = arith.constant 0 : index
      %20 = vector.load %arg4[%c0_13, %c0_14] : memref<1x64xf32, #tpu.memory_space<vmem>>, vector<1x64xf32>
      %c0_15 = arith.constant 0 : index
      %c0_16 = arith.constant 0 : index
      %21 = vector.load %arg5[%c0_15, %c0_16] : memref<1x64xf32, #tpu.memory_space<vmem>>, vector<1x64xf32>
      %22 = math.exp %21 : vector<1x64xf32>
      %23 = arith.mulf %20, %20 : vector<1x64xf32>
      %24 = arith.addf %22, %23 : vector<1x64xf32>
      %cst_17 = arith.constant 1.000000e+00 : f32
      %25 = vector.broadcast %cst_17 : f32 to vector<1x64xf32>
      %26 = arith.subf %24, %25 : vector<1x64xf32>
      %27 = arith.subf %26, %21 : vector<1x64xf32>
      %28 = vector.shape_cast %27 : vector<1x64xf32> to vector<1x1x64xf32>
      %cst_18 = arith.constant dense<0.000000e+00> : vector<1xf32>
      %29 = vector.multi_reduction <add>, %28, %cst_18 [1, 2] : vector<1x1x64xf32> to vector<1xf32>
      %30 = vector.shape_cast %29 : vector<1xf32> to vector<1x1x1xf32>
      %31 = vector.extract %30[0, 0, 0] : f32 from vector<1x1x1xf32>
      %cst_19 = arith.constant 5.000000e-01 : f32
      %32 = arith.mulf %cst_19, %31 : f32
      %c0_20 = arith.constant 0 : index
      %c0_21 = arith.constant 0 : index
      %33 = vector.load %arg6[%c0_20, %c0_21] : memref<8x128xf32, #tpu.memory_space<vmem>>, vector<8x128xf32>
      %cst_22 = arith.constant 1881.98608 : f32
      %34 = arith.addf %32, %cst_22 : f32
      %35 = vector.broadcast %34 : f32 to vector<8x128xf32>
      %36 = arith.addf %33, %35 : vector<8x128xf32>
      %c0_23 = arith.constant 0 : index
      %c0_24 = arith.constant 0 : index
      %37 = vector.load %arg6[%c0_23, %c0_24] : memref<8x128xf32, #tpu.memory_space<vmem>>, vector<8x128xf32>
      tpu.vector_store %arg6[%c0_23, %c0_24], %36 {strides = array<i32>} : memref<8x128xf32, #tpu.memory_space<vmem>>, vector<8x128xf32>,
    } else {
    }
    return
  }
  func.func @transform_0(%arg0: i32, %arg1: i32) -> (i32, i32) {
    %c1_i32 = arith.constant 1 : i32
    %0 = arith.muli %arg0, %c1_i32 : i32
    %1 = arith.addi %0, %arg1 : i32
    %c0_i32 = arith.constant 0 : i32
    %c0_i32_0 = arith.constant 0 : i32
    return %1, %c0_i32 : i32, i32
  }
  func.func @transform_1(%arg0: i32, %arg1: i32) -> (i32, i32) {
    %c1_i32 = arith.constant 1 : i32
    %0 = arith.muli %arg0, %c1_i32 : i32
    %1 = arith.addi %0, %arg1 : i32
    %c0_i32 = arith.constant 0 : i32
    %c0_i32_0 = arith.constant 0 : i32
    return %1, %c0_i32 : i32, i32
  }
  func.func @transform_2(%arg0: i32, %arg1: i32) -> (i32, i32) {
    %c0_i32 = arith.constant 0 : i32
    %c0_i32_0 = arith.constant 0 : i32
    %c0_i32_1 = arith.constant 0 : i32
    return %c0_i32, %c0_i32_0 : i32, i32
  }
  func.func @transform_3(%arg0: i32, %arg1: i32) -> (i32, i32) {
    %c0_i32 = arith.constant 0 : i32
    %c0_i32_0 = arith.constant 0 : i32
    %c0_i32_1 = arith.constant 0 : i32
    return %c0_i32, %c0_i32_0 : i32, i32
  }
  func.func @transform_4(%arg0: i32, %arg1: i32) -> (i32, i32) {
    %c0_i32 = arith.constant 0 : i32
    %c0_i32_0 = arith.constant 0 : i32
    return %arg0, %c0_i32 : i32, i32
  }
}

</mosaic_0001>

<bundles_post_ra>
// kernel: tpu_custom_call.1
= control target key start
LH: loop header
LB: loop body
LE: loop exit
PB: predicated region body
PF: predicated region fallthrough
CT: control target
= control target key end

     0   :  { %9 = vsyncpa [#allocation4], 0  ;;  %s304_s0 = inlined_call_operand.hbm [shape: f32[4,512], index: 0, kind: input, shape index: {}]   ;;  %s305_s1 = inlined_call_operand.hbm [shape: f32[4,512], index: 1, kind: input, shape index: {}]   ;;  %s306_s2 = inlined_call_operand.vmem [shape: f32[1,64], index: 2, kind: input, shape index: {}]   ;;  %s307_s3 = inlined_call_operand.vmem [shape: f32[1,64], index: 3, kind: input, shape index: {}]   ;;  %s308_s4 = inlined_call_operand.hbm [shape: f32[8,128], index: 4, kind: output, shape index: {}]  }
   0x1   :  { %10 = vsyncpa [#allocation7], 0 }
   0x2   :  { %11 = vsyncpa [#allocation5], 0  ;;  %s234_s15 = smov [#allocation3]   ;;  %s235_s17 = smov [#allocation6]  }
   0x3   :  { %s22_s16 = sshll.u32 %s234_s15, 4  ;;  %s36_s18 = sshll.u32 %s235_s17, 4  ;;  %s23_s16 = int_to_ptr.vmem [resolvable:$true] %s22_s16  ;;  %s37_s18 = int_to_ptr.vmem [resolvable:$true] %s36_s18 }
   0x4   :  { %s162_s21 = scalar_lea.hbm %s304_s0, 256 }
   0x5   :  { %p163_p0 = scmp.ne.s32.totalorder %s304_s0, %s162_s21  ;;  %p166_p1 = scmp.lt.u32.totalorder %s162_s21, %s304_s0 }
   0x7   :  { %p168_p2 = pnand %p166_p1, %p163_p0 }
   0x9   :  { %171 = shalt.err (!%p168_p2)
}
   0xa   :  { %s172_s26 = scalar_lea.vmem %s23_s16, 256  ;;  %p177_p4 = scmp.lt.s32.totalorder %s23_s16, %s23_s16 }
   0xb   :  { %p173_p3 = scmp.ne.s32.totalorder %s23_s16, %s172_s26  ;;  %p178_p5 = scmp.lt.s32.totalorder %s172_s26, %s172_s26 }
   0xd   :  { %p179_p6 = por %p178_p5, %p177_p4 }
   0xf   :  { %p180_p7 = pnand %p179_p6, %p173_p3 }
  0x11   :  { %183 = shalt.err (!%p180_p7)
}
  0x12   :  { %25 = dma.hbm_to_vmem [thread:$0]  %s304_s0, 256, %s23_s16, [#allocation4]  }
  0x13   :  { %s184_s5 = scalar_lea.hbm %s305_s1, 256 }
  0x14   :  { %p185_p8 = scmp.ne.s32.totalorder %s305_s1, %s184_s5  ;;  %p188_p9 = scmp.lt.u32.totalorder %s184_s5, %s305_s1 }
  0x16   :  { %p190_p10 = pnand %p188_p9, %p185_p8 }
  0x18   :  { %193 = shalt.err (!%p190_p10)
}
  0x19   :  { %s194_s10 = scalar_lea.vmem %s37_s18, 256  ;;  %p199_p12 = scmp.lt.s32.totalorder %s37_s18, %s37_s18 }
  0x1a   :  { %p195_p11 = scmp.ne.s32.totalorder %s37_s18, %s194_s10  ;;  %p200_p13 = scmp.lt.s32.totalorder %s194_s10, %s194_s10 }
  0x1c   :  { %p201_p0 = por %p200_p13, %p199_p12 }
  0x1e   :  { %p202_p1 = pnand %p201_p0, %p195_p11 }
  0x20   :  { %205 = shalt.err (!%p202_p1)
}
  0x21   :  { %39 = dma.hbm_to_vmem [thread:$0]  %s305_s1, 256, %s37_s18, [#allocation7]  }
  0x22   :  { %228 = dma.done.wait [#allocation4], 256  }
  0x23   :  { %229 = vsyncadd [#allocation4], 4294967040 }
  0x24   :  { %230 = dma.done.wait [#allocation7], 256  }
  0x25   :  { %231 = vsyncadd [#allocation7], 4294967040  ;;  %v58_v0 = vld [vmem:[#allocation3] sm:$0xff]  ;;  %v59_v1 = vld [vmem:[#allocation3 + $0x8] sm:$0xff]  ;;  %vm85_vm0 = vcmask 1043456   ;;  %vm119_vm1 = vcmask 516096  }
  0x26   :  { %v60_v2 = vld [vmem:[#allocation6] sm:$0xff]  ;;  %v61_v3 = vld [vmem:[#allocation6 + $0x8] sm:$0xff]  ;;  %v112_v5 = vld [vmem:[%s307_s3] sm:$0x1]  ;;  %s236_s18 = smov [#allocation8]  }
  0x27   :  { %v62_v4 = vsub.f32 %v58_v0, %v60_v2  ;;  %v63_v6 = vsub.f32 %v59_v1, %v61_v3  ;;  %v113_v7 = vmul.f32 1.442695, %v112_v5  ;;  %v111_v16 = vld [vmem:[%s306_s2] sm:$0x1]  ;;  %s142_s19 = sshll.u32 %s236_s18, 4  ;;  %s143_s19 = int_to_ptr.vmem [resolvable:$true] %s142_s19 }
  0x28   :  { %v115_v19 = vmul.f32 %v111_v16, %v111_v16  ;;  %s206_s20 = scalar_lea.vmem %s143_s19, 128  ;;  %p211_p3 = scmp.lt.s32.totalorder %s143_s19, %s143_s19 }
  0x29   :  { %v64_v8 = vmul.f32 %v62_v4, %v62_v4  ;;  %v65_v9 = vmul.f32 %v63_v6, %v63_v6  ;;  %160 = vpow2.f32 %v113_v7  ;;  %p207_p2 = scmp.ne.s32.totalorder %s143_s19, %s206_s20  ;;  %p212_p4 = scmp.lt.s32.totalorder %s206_s20, %s206_s20 }
  0x2b   :  { %v81_v10 = vcombine.high %v64_v8, %v64_v8  ;;  %v86_v11 = vsel %vm85_vm0, %v64_v8, 0.0  ;;  %v82_v12 = vcombine.high %v65_v9, %v65_v9  ;;  %v89_v14 = vsel %vm85_vm0, %v65_v9, 0.0  ;;  %p213_p5 = por %p212_p4, %p211_p3 }
  0x2d   :  { %v87_v13 = vsel %vm85_vm0, %v81_v10, 0.0  ;;  %v91_v17 = vsel %vm85_vm0, %v82_v12, 0.0  ;;  %p214_p6 = pnand %p213_p5, %p207_p2 }
  0x2e   :  { %v88_v15 = vadd.f32 %v87_v13, %v86_v11 }
  0x30   :  { %v90_v18 = vadd.f32 %v89_v14, %v88_v15 }
  0x32   :  { %v92_v20 = vadd.f32 %v91_v17, %v90_v18 }
  0x33   :  { %v161_v21 = vpop.eup %160 }
  0x34   :  { %93 = vadd.xlane.f32.xlu0 %v92_v20  ;;  %v116_v22 = vadd.f32 %v161_v21, %v115_v19 }
  0x36   :  { %v152_v23 = vadd.f32 -1.0, %v116_v22 }
  0x38   :  { %v118_v24 = vsub.f32 %v152_v23, %v112_v5 }
  0x3a   :  { %v120_v25 = vsel %vm119_vm1, %v118_v24, 0.0 }
  0x3b   :  { %121 = vadd.xlane.f32.xlu0 %v120_v25 }
  0xc1   :  { %v94_v26 = vpop.xlane.xlu0 %93 }
  0xc2   :  { %v95_v27 = vrot.slane %v94_v26, 4 }
  0xc4   :  { %v96_v28 = vadd.f32 %v95_v27, %v94_v26 }
  0xc6   :  { %v97_v29 = vrot.slane %v96_v28, 2 }
  0xc8   :  { %v98_v30 = vadd.f32 %v97_v29, %v96_v28  ;;  %v122_v31 = vpop.xlane.xlu0 %121 }
  0xc9   :  { %v123_v32 = vrot.slane %v122_v31, 4 }
  0xca   :  { %v99_v33 = vrot.slane %v98_v30, 1 }
  0xcb   :  { %v124_v34 = vadd.f32 %v123_v32, %v122_v31 }
  0xcc   :  { %v100_v35 = vadd.f32 %v99_v33, %v98_v30 }
  0xcd   :  { %v125_v36 = vrot.slane %v124_v34, 2 }
  0xce   :  { %153 = vpush %v100_v35 }
  0xcf   :  { %v126_v37 = vadd.f32 %v125_v36, %v124_v34 }
  0xd1   :  { %v127_v38 = vrot.slane %v126_v37, 1 }
  0xd3   :  { %v128_v39 = vadd.f32 %v127_v38, %v126_v37 }
  0xd5   :  { %155 = vpush %v128_v39 }
  0xff   :  { %s154_s2 = spop %153 }
 0x100   :  { %s102_s3 = smul.f32 0.5, %s154_s2 }
 0x102   :  { %v103_v40 = vstv %s102_s3 }
 0x106   :  { %s156_s15 = spop %155 }
 0x107   :  { %s130_s16 = smul.f32 0.5, %s156_s15 }
 0x109   :  { %s132_s17 = sadd.f32 1881.9861, %s130_s16 }
 0x10b   :  { %v133_v41 = vstv %s132_s17 }
 0x10c   :  { %v134_v42 = vadd.f32 %v133_v41, %v103_v40 }
 0x10e   :  { %135 = vst [vmem:[#allocation8] sm:$0xff] %v134_v42 }
 0x10f   :  { %217 = shalt.err (!%p214_p6)
}
 0x110   :  { %s218_s23 = scalar_lea.hbm %s308_s4, 128 }
 0x111   :  { %p219_p7 = scmp.ne.s32.totalorder %s308_s4, %s218_s23  ;;  %p222_p8 = scmp.lt.u32.totalorder %s218_s23, %s308_s4 }
 0x113   :  { %p224_p9 = pnand %p222_p8, %p219_p7 }
 0x115   :  { %227 = shalt.err (!%p224_p9)
}
 0x116   :  { %145 = dma.vmem_to_hbm [thread:$0]  %s143_s19, 128, %s308_s4, [#allocation5]  }
 0x117   :  { %232 = dma.done.wait [#allocation5], 128  }
 0x118   :  { %233 = vsyncadd [#allocation5], 4294967168 }
 0x119   :  { %149 = vsyncpa [#allocation4], 1 }
 0x11a   :  { %150 = vsyncpa [#allocation7], 1 }
 0x11b   :  { %151 = vsyncpa [#allocation5], 1 }

</bundles_post_ra>
